<compile_context>
chip_gen: v5e
topology: v5e:2x2
jax: 0.10.0
libtpu: 0.0.40
codegen_flags: <defaults>
</compile_context>

<pallas_src>
import functools

import jax
import jax.numpy as jnp
from jax.experimental import pallas as pl
from jax.experimental.pallas import tpu as pltpu


def _round_up(n, m):
    return ((n + m - 1) // m) * m


def _sage_layer_kernel(a_ref, xk_ref, xi_ref, w_ref, b_ref, o_ref, acc_ref,
                       *, apply_relu, feat):
    """One SAGEConv layer tile: grid = (row_tiles, neighbor_col_tiles).

    For row tile i:
      acc = sum_k A[i, k] @ X[k]          (mean aggregation, f32 accumulate)
      out = acc @ W_l + X[i] @ W_r + b    (fused epilogue, no concat buffer)
      out = relu(out)                     (layer 1 only)
    """
    k = pl.program_id(1)

    # Neighbor aggregation: bf16 MXU matmul, f32 accumulation.  First k-step
    # writes directly into the accumulator (no zero-init read-modify-write).
    prod = jnp.dot(a_ref[...], xk_ref[...], preferred_element_type=jnp.float32)

    @pl.when(k == 0)
    def _():
        acc_ref[...] = prod

    @pl.when(k > 0)
    def _():
        acc_ref[...] += prod

    @pl.when(k == pl.num_programs(1) - 1)
    def _():
        # [agg, root] @ [W_l; W_r] == agg @ W_l + root @ W_r.  Slicing the
        # fused weight at `feat` (a multiple of 128) stays on (8,128) tile
        # boundaries, so the half-views cost nothing and there is no concat
        # store/reload on the serial last-k critical path.
        out = jnp.dot(acc_ref[...].astype(jnp.bfloat16), w_ref[:feat, :],
                      preferred_element_type=jnp.float32)
        out = out + jnp.dot(xi_ref[...], w_ref[feat:, :],
                            preferred_element_type=jnp.float32)
        out = out + b_ref[...]
        if apply_relu:
            out = jnp.maximum(out, 0.0)
        o_ref[...] = out.astype(o_ref.dtype)


def _sage_layer(a, x, w, b, *, apply_relu, out_dtype, tm, tk, vmem_limit):
    n_pad = a.shape[0]
    fp = x.shape[1]
    hp = w.shape[1]
    grid = (n_pad // tm, n_pad // tk)

    flops = 2 * n_pad * n_pad * fp + 2 * n_pad * (2 * fp) * hp
    # True HBM traffic: A once, neighbor-X re-streamed once per row tile,
    # root-X / weights / bias / output once each.
    bytes_accessed = (
        a.size * a.dtype.itemsize
        + grid[0] * x.size * x.dtype.itemsize      # neighbor-X re-reads
        + x.size * x.dtype.itemsize                # root-X
        + w.size * w.dtype.itemsize
        + b.size * b.dtype.itemsize
        + n_pad * hp * jnp.dtype(out_dtype).itemsize)

    kernel = functools.partial(_sage_layer_kernel,
                               apply_relu=apply_relu, feat=fp)
    return pl.pallas_call(
        kernel,
        out_shape=jax.ShapeDtypeStruct((n_pad, hp), out_dtype),
        grid_spec=pltpu.PrefetchScalarGridSpec(
            num_scalar_prefetch=0,
            grid=grid,
            in_specs=[
                pl.BlockSpec((tm, tk), lambda i, k: (i, k)),      # A row/col tile
                pl.BlockSpec((tk, fp), lambda i, k: (k, 0)),      # X neighbor rows
                pl.BlockSpec((tm, fp), lambda i, k: (i, 0)),      # X root rows (resident per i)
                pl.BlockSpec((2 * fp, hp), lambda i, k: (0, 0)),  # fused [W_l; W_r] (resident)
                pl.BlockSpec((1, hp), lambda i, k: (0, 0)),       # bias (resident)
            ],
            out_specs=pl.BlockSpec((tm, hp), lambda i, k: (i, 0)),
            scratch_shapes=[
                pltpu.VMEM((tm, fp), jnp.float32),   # aggregation accumulator
            ],
        ),
        compiler_params=pltpu.CompilerParams(
            dimension_semantics=("parallel", "arbitrary"),
            vmem_limit_bytes=vmem_limit,
        ),
        cost_estimate=pl.CostEstimate(flops=flops, transcendentals=0,
                                      bytes_accessed=bytes_accessed),
    )(a, x, x, w, b)   # x passed twice: neighbor stream + resident root tile


def _vmem_capacity_bytes():
    # Per-generation VMEM (v5e/v6e: 128 MiB, v7x: 64 MiB); conservative
    # fallback if the query is unavailable (e.g. interpret mode).
    try:
        return int(pltpu.get_tpu_info().vmem_capacity_bytes)
    except Exception:
        return 64 * 1024 * 1024


def _pick_tile(n_nodes, vmem_bytes):
    # HBM-bound regime: bigger row/col tiles cut the redundant neighbor-X
    # stream (re-read once per row tile) and the ~0.35 us per-grid-step
    # overhead.  Cap at 512 on 64 MiB-VMEM parts (v7x), 1024 on 128 MiB parts.
    cap = 1024 if vmem_bytes >= 96 * 1024 * 1024 else 512
    t = 128
    while t < cap and n_nodes >= 2 * t:
        t *= 2
    return t


def build_norm_adj(edge_index, num_nodes):
    """Dense row-normalized adjacency: A[i, j] = (# edges j->i) / deg(i).

    Matches PyG scatter-mean (duplicate edges counted, isolated nodes -> 0)."""
    src = edge_index[0]
    dst = edge_index[1]
    a = jnp.zeros((num_nodes, num_nodes), jnp.float32).at[dst, src].add(1.0)
    deg = a.sum(axis=1, keepdims=True)
    return a / jnp.maximum(deg, 1.0)


def gnn_encoder_forward(x, edge_index, params):
    n, f_in = x.shape
    hidden = params["w1l"].shape[1]
    out_ch = params["w2l"].shape[1]

    # Lane-dense feature padding (multiples of 128).
    fp = _round_up(f_in, 128)
    hp = _round_up(hidden, 128)
    op = _round_up(out_ch, 128)

    vmem_bytes = _vmem_capacity_bytes()
    tile = _pick_tile(n, vmem_bytes)
    # ~48 MiB pipelining limit on 64 MiB parts, ~96 MiB on 128 MiB parts.
    vmem_limit = min(96 * 1024 * 1024, (vmem_bytes // 4) * 3)
    n_pad = _round_up(n, tile)

    # Dense row-normalized adjacency, streamed in bf16 (dominant HBM stream).
    a = build_norm_adj(edge_index, n)
    a_pad = jnp.zeros((n_pad, n_pad), jnp.bfloat16).at[:n, :n].set(
        a.astype(jnp.bfloat16))
    x_pad = jnp.zeros((n_pad, fp), jnp.bfloat16).at[:n, :f_in].set(
        x.astype(jnp.bfloat16))

    # Fused, zero-padded [W_l; W_r] weights (bf16) and biases (f32).
    w1 = jnp.zeros((2 * fp, hp), jnp.bfloat16)
    w1 = w1.at[:f_in, :hidden].set(params["w1l"].astype(jnp.bfloat16))
    w1 = w1.at[fp:fp + f_in, :hidden].set(params["w1r"].astype(jnp.bfloat16))
    b1 = jnp.zeros((1, hp), jnp.float32).at[:, :hidden].set(params["b1"])

    w2 = jnp.zeros((2 * hp, op), jnp.bfloat16)
    w2 = w2.at[:hidden, :out_ch].set(params["w2l"].astype(jnp.bfloat16))
    w2 = w2.at[hp:hp + hidden, :out_ch].set(params["w2r"].astype(jnp.bfloat16))
    b2 = jnp.zeros((1, op), jnp.float32).at[:, :out_ch].set(params["b2"])

    # Layer 1 (ReLU fused into epilogue); h stays bf16 for layer-2's MXU.
    h = _sage_layer(a_pad, x_pad, w1, b1, apply_relu=True,
                    out_dtype=jnp.bfloat16, tm=tile, tk=tile,
                    vmem_limit=vmem_limit)
    # Layer 2.
    y = _sage_layer(a_pad, h, w2, b2, apply_relu=False,
                    out_dtype=jnp.float32, tm=tile, tk=tile,
                    vmem_limit=vmem_limit)
    return y[:n, :out_ch]


def reference_forward(x, edge_index, params):
    """Plain-JAX f32 reference for validation."""
    a = build_norm_adj(edge_index, x.shape[0])
    h = (a @ x) @ params["w1l"] + x @ params["w1r"] + params["b1"]
    h = jnp.maximum(h, 0.0)
    return (a @ h) @ params["w2l"] + h @ params["w2r"] + params["b2"]


def init_params(key, in_channels, hidden_channels, out_channels):
    ks = jax.random.split(key, 6)
    s1 = 1.0 / jnp.sqrt(in_channels)
    s2 = 1.0 / jnp.sqrt(hidden_channels)
    return {
        # conv1: lin_l (with bias) on aggregated neighbors, lin_r on root
        "w1l": jax.random.uniform(ks[0], (in_channels, hidden_channels),
                                  jnp.float32, -s1, s1),
        "w1r": jax.random.uniform(ks[1], (in_channels, hidden_channels),
                                  jnp.float32, -s1, s1),
        "b1": jax.random.uniform(ks[2], (1, hidden_channels),
                                 jnp.float32, -s1, s1),
        # conv2
        "w2l": jax.random.uniform(ks[3], (hidden_channels, out_channels),
                                  jnp.float32, -s2, s2),
        "w2r": jax.random.uniform(ks[4], (hidden_channels, out_channels),
                                  jnp.float32, -s2, s2),
        "b2": jax.random.uniform(ks[5], (1, out_channels),
                                 jnp.float32, -s2, s2),
    }


if __name__ == "__main__":
    key = jax.random.PRNGKey(0)
    k_x, k_e_src, k_e_dst, k_p = jax.random.split(key, 4)

    num_nodes = 16
    in_channels = 8
    hidden_channels = 32
    out_channels = 16
    num_edges = 48

    x = jax.random.normal(k_x, (num_nodes, in_channels), jnp.float32)
    edge_index = jnp.stack([
        jax.random.randint(k_e_src, (num_edges,), 0, num_nodes),
        jax.random.randint(k_e_dst, (num_edges,), 0, num_nodes),
    ], axis=0)  # (2, E): row 0 = source nodes, row 1 = target nodes

    params = init_params(k_p, in_channels, hidden_channels, out_channels)

    out = gnn_encoder_forward(x, edge_index, params)
    out = jax.block_until_ready(out)

    ref = reference_forward(x, edge_index, params)
    assert out.shape == (num_nodes, out_channels)
    # bf16 MXU inputs with f32 accumulation -> relaxed tolerance vs f32 reference.
    assert jnp.allclose(out, ref, atol=5e-2, rtol=5e-2)

    print("KERNEL_OK")
</pallas_src>

<mosaic_0001>
module attributes {stable_mosaic.version = 11 : i64} {
  func.func @_sage_layer_kernel(%arg0: i32, %arg1: i32, %arg2: memref<128x128xbf16, #tpu.memory_space<vmem>>, %arg3: memref<128x128xbf16, #tpu.memory_space<vmem>>, %arg4: memref<128x128xbf16, #tpu.memory_space<vmem>>, %arg5: memref<256x128xbf16, #tpu.memory_space<vmem>>, %arg6: memref<1x128xf32, #tpu.memory_space<vmem>>, %arg7: memref<128x128xbf16, #tpu.memory_space<vmem>>, %arg8: memref<128x128xf32, #tpu.memory_space<vmem>>) attributes {dimension_semantics = [#tpu.dimension_semantics<parallel>, #tpu.dimension_semantics<arbitrary>], iteration_bounds = array<i64: 1, 1>, scalar_prefetch = 0 : i64, scratch_operands = 1 : i64, tpu.core_type = #tpu.core_type<tc>, window_params = [{transform_indices = @transform_0, window_bounds = array<i64: 128, 128>}, {transform_indices = @transform_1, window_bounds = array<i64: 128, 128>}, {transform_indices = @transform_2, window_bounds = array<i64: 128, 128>}, {pipeline_mode = #tpu.pipeline_mode<synchronous>, transform_indices = @transform_3, window_bounds = array<i64: 256, 128>}, {pipeline_mode = #tpu.pipeline_mode<synchronous>, transform_indices = @transform_4, window_bounds = array<i64: 1, 128>}, {transform_indices = @transform_5, window_bounds = array<i64: 128, 128>}]} {
    %c0 = arith.constant 0 : index
    %c0_0 = arith.constant 0 : index
    %0 = vector.load %arg2[%c0, %c0_0] : memref<128x128xbf16, #tpu.memory_space<vmem>>, vector<128x128xbf16>
    %c0_1 = arith.constant 0 : index
    %c0_2 = arith.constant 0 : index
    %1 = vector.load %arg3[%c0_1, %c0_2] : memref<128x128xbf16, #tpu.memory_space<vmem>>, vector<128x128xbf16>
    %cst = arith.constant dense<0.000000e+00> : vector<128x128xf32>
    %2 = tpu.matmul %0, %1, %cst {dimension_numbers = #tpu.dot_dimension_numbers<[1], [0], [0], [1], [0, 0, 1, 1], [], []>} : vector<128x128xbf16>, vector<128x128xbf16>, vector<128x128xf32> -> vector<128x128xf32>
    %c0_i32 = arith.constant 0 : i32
    %3 = arith.cmpi eq, %arg1, %c0_i32 : i32
    %4 = arith.extui %3 : i1 to i32
    %c0_i32_3 = arith.constant 0 : i32
    %5 = arith.cmpi ne, %4, %c0_i32_3 : i32
    scf.if %5 {
      %c0_8 = arith.constant 0 : index
      %c0_9 = arith.constant 0 : index
      %12 = vector.load %arg8[%c0_8, %c0_9] : memref<128x128xf32, #tpu.memory_space<vmem>>, vector<128x128xf32>
      tpu.vector_store %arg8[%c0_8, %c0_9], %2 {strides = array<i32>} : memref<128x128xf32, #tpu.memory_space<vmem>>, vector<128x128xf32>,
    } else {
    }
    %c0_i32_4 = arith.constant 0 : i32
    %6 = arith.cmpi sgt, %arg1, %c0_i32_4 : i32
    %7 = arith.extui %6 : i1 to i32
    %c0_i32_5 = arith.constant 0 : i32
    %8 = arith.cmpi ne, %7, %c0_i32_5 : i32
    scf.if %8 {
      %c0_8 = arith.constant 0 : index
      %c0_9 = arith.constant 0 : index
      %12 = vector.load %arg8[%c0_8, %c0_9] : memref<128x128xf32, #tpu.memory_space<vmem>>, vector<128x128xf32>
      %13 = arith.addf %12, %2 : vector<128x128xf32>
      %c0_10 = arith.constant 0 : index
      %c0_11 = arith.constant 0 : index
      %14 = vector.load %arg8[%c0_10, %c0_11] : memref<128x128xf32, #tpu.memory_space<vmem>>, vector<128x128xf32>
      tpu.vector_store %arg8[%c0_10, %c0_11], %13 {strides = array<i32>} : memref<128x128xf32, #tpu.memory_space<vmem>>, vector<128x128xf32>,
    } else {
    }
    %c0_i32_6 = arith.constant 0 : i32
    %9 = arith.cmpi eq, %arg1, %c0_i32_6 : i32
    %10 = arith.extui %9 : i1 to i32
    %c0_i32_7 = arith.constant 0 : i32
    %11 = arith.cmpi ne, %10, %c0_i32_7 : i32
    scf.if %11 {
      %c0_8 = arith.constant 0 : index
      %c0_9 = arith.constant 0 : index
      %12 = vector.load %arg8[%c0_8, %c0_9] : memref<128x128xf32, #tpu.memory_space<vmem>>, vector<128x128xf32>
      %13 = arith.truncf %12 : vector<128x128xf32> to vector<128x128xbf16>
      %c0_10 = arith.constant 0 : index
      %c0_11 = arith.constant 0 : index
      %14 = vector.load %arg5[%c0_10, %c0_11] : memref<256x128xbf16, #tpu.memory_space<vmem>>, vector<128x128xbf16>
      %cst_12 = arith.constant dense<0.000000e+00> : vector<128x128xf32>
      %15 = tpu.matmul %13, %14, %cst_12 {dimension_numbers = #tpu.dot_dimension_numbers<[1], [0], [0], [1], [0, 0, 1, 1], [], []>} : vector<128x128xbf16>, vector<128x128xbf16>, vector<128x128xf32> -> vector<128x128xf32>
      %c0_13 = arith.constant 0 : index
      %c0_14 = arith.constant 0 : index
      %16 = vector.load %arg4[%c0_13, %c0_14] : memref<128x128xbf16, #tpu.memory_space<vmem>>, vector<128x128xbf16>
      %c128 = arith.constant 128 : index
      %c0_15 = arith.constant 0 : index
      %17 = vector.load %arg5[%c128, %c0_15] : memref<256x128xbf16, #tpu.memory_space<vmem>>, vector<128x128xbf16>
      %cst_16 = arith.constant dense<0.000000e+00> : vector<128x128xf32>
      %18 = tpu.matmul %16, %17, %cst_16 {dimension_numbers = #tpu.dot_dimension_numbers<[1], [0], [0], [1], [0, 0, 1, 1], [], []>} : vector<128x128xbf16>, vector<128x128xbf16>, vector<128x128xf32> -> vector<128x128xf32>
      %19 = arith.addf %15, %18 : vector<128x128xf32>
      %c0_17 = arith.constant 0 : index
      %c0_18 = arith.constant 0 : index
      %20 = vector.load %arg6[%c0_17, %c0_18] : memref<1x128xf32, #tpu.memory_space<vmem>>, vector<1x128xf32>
      %21 = vector.broadcast %20 : vector<1x128xf32> to vector<128x128xf32>
      %22 = arith.addf %19, %21 : vector<128x128xf32>
      %cst_19 = arith.constant 0.000000e+00 : f32
      %23 = vector.broadcast %cst_19 : f32 to vector<128x128xf32>
      %24 = arith.maximumf %22, %23 : vector<128x128xf32>
      %25 = arith.truncf %24 : vector<128x128xf32> to vector<128x128xbf16>
      %c0_20 = arith.constant 0 : index
      %c0_21 = arith.constant 0 : index
      %26 = vector.load %arg7[%c0_20, %c0_21] : memref<128x128xbf16, #tpu.memory_space<vmem>>, vector<128x128xbf16>
      tpu.vector_store %arg7[%c0_20, %c0_21], %25 {strides = array<i32>} : memref<128x128xbf16, #tpu.memory_space<vmem>>, vector<128x128xbf16>,
    } else {
    }
    return
  }
  func.func @transform_0(%arg0: i32, %arg1: i32) -> (i32, i32) {
    %c0_i32 = arith.constant 0 : i32
    return %arg0, %arg1 : i32, i32
  }
  func.func @transform_1(%arg0: i32, %arg1: i32) -> (i32, i32) {
    %c0_i32 = arith.constant 0 : i32
    %c0_i32_0 = arith.constant 0 : i32
    return %arg1, %c0_i32 : i32, i32
  }
  func.func @transform_2(%arg0: i32, %arg1: i32) -> (i32, i32) {
    %c0_i32 = arith.constant 0 : i32
    %c0_i32_0 = arith.constant 0 : i32
    return %arg0, %c0_i32 : i32, i32
  }
  func.func @transform_3(%arg0: i32, %arg1: i32) -> (i32, i32) {
    %c0_i32 = arith.constant 0 : i32
    %c0_i32_0 = arith.constant 0 : i32
    %c0_i32_1 = arith.constant 0 : i32
    return %c0_i32, %c0_i32_0 : i32, i32
  }
  func.func @transform_4(%arg0: i32, %arg1: i32) -> (i32, i32) {
    %c0_i32 = arith.constant 0 : i32
    %c0_i32_0 = arith.constant 0 : i32
    %c0_i32_1 = arith.constant 0 : i32
    return %c0_i32, %c0_i32_0 : i32, i32
  }
  func.func @transform_5(%arg0: i32, %arg1: i32) -> (i32, i32) {
    %c0_i32 = arith.constant 0 : i32
    %c0_i32_0 = arith.constant 0 : i32
    return %arg0, %c0_i32 : i32, i32
  }
}

</mosaic_0001>

<bundles_post_ra>
// kernel: tpu_custom_call.1
= control target key start
LH: loop header
LB: loop body
LE: loop exit
PB: predicated region body
PF: predicated region fallthrough
CT: control target
= control target key end

     0   :  { %10 = vsyncpa [#allocation4], 0  ;;  %s1234_s0 = inlined_call_operand.hbm [shape: bf16[128,128], index: 0, kind: input, shape index: {}]   ;;  %s1235_s1 = inlined_call_operand.hbm [shape: bf16[128,128], index: 1, kind: input, shape index: {}]   ;;  %s1236_s2 = inlined_call_operand.hbm [shape: bf16[128,128], index: 2, kind: input, shape index: {}]   ;;  %s1237_s3 = inlined_call_operand.hbm [shape: bf16[256,128], index: 3, kind: input, shape index: {}]   ;;  %s1238_s4 = inlined_call_operand.vmem [shape: f32[1,128], index: 4, kind: input, shape index: {}]   ;;  %s1239_s5 = inlined_call_operand.hbm [shape: bf16[128,128], index: 5, kind: output, shape index: {}]  }
   0x1   :  { %11 = vsyncpa [#allocation7], 0 }
   0x2   :  { %12 = vsyncpa [#allocation10], 0 }
   0x3   :  { %13 = vsyncpa [#allocation5], 0  ;;  %s31_s20 = sshll.u32 %s1235_s1, 4  ;;  %s1146_s21 = smov [#allocation6]   ;;  %s32_s20 = int_to_ptr.hbm [resolvable:$true] %s31_s20 }
   0x4   :  { %s33_s22 = sshll.u32 %s1146_s21, 4  ;;  %s18_s25 = sshll.u32 %s1234_s0, 4  ;;  %s34_s22 = int_to_ptr.vmem [resolvable:$true] %s33_s22  ;;  %s19_s25 = int_to_ptr.hbm [resolvable:$true] %s18_s25 }
   0x5   :  { %s1147_s26 = smov 64   ;;  %s1148_s27 = smov 4  }
   0x6   :  { %39 = dma.hbm_to_vmem [thread:$0]  %s32_s20, 1024, %s34_s22, [#allocation7], %s1147_s26, %s1147_s26, %s1148_s27  }
   0x7   :  { %s1149_s28 = smov [#allocation3]   ;;  %s44_s1 = sshll.u32 %s1236_s2, 4  ;;  %s45_s1 = int_to_ptr.hbm [resolvable:$true] %s44_s1 }
   0x8   :  { %s20_s29 = sshll.u32 %s1149_s28, 4  ;;  %s57_s8 = sshll.u32 %s1237_s3, 4  ;;  %s21_s29 = int_to_ptr.vmem [resolvable:$true] %s20_s29  ;;  %s58_s8 = int_to_ptr.hbm [resolvable:$true] %s57_s8 }
   0x9   :  { %26 = dma.hbm_to_vmem [thread:$0]  %s19_s25, 1024, %s21_s29, [#allocation4], %s1147_s26, %s1147_s26, %s1148_s27  }
   0xa   :  { %s1150_s9 = smov [#allocation8]   ;;  %s1151_s11 = smov [#allocation9]  }
   0xb   :  { %s46_s10 = sshll.u32 %s1150_s9, 4  ;;  %s59_s2 = sshll.u32 %s1151_s11, 4  ;;  %s47_s10 = int_to_ptr.vmem [resolvable:$true] %s46_s10  ;;  %s60_s2 = int_to_ptr.vmem [resolvable:$true] %s59_s2 }
   0xc   :  { %52 = dma.hbm_to_vmem [thread:$0]  %s45_s1, 1024, %s47_s10, [#allocation7], %s1147_s26, %s1147_s26, %s1148_s27  }
   0xd   :  { %65 = dma.hbm_to_vmem [thread:$0]  %s58_s8, 2048, %s60_s2, [#allocation10], %s1147_s26, %s1147_s26, %s1148_s27  }
   0xe   :  { %1138 = dma.done.wait [#allocation4], 1024  }
   0xf   :  { %1139 = vsyncadd [#allocation4], 4294966272 }
  0x10   :  { %1140 = dma.done.wait [#allocation7], 2048  }
  0x11   :  { %1141 = vsyncadd [#allocation7], 4294965248 }
  0x12   :  { %1142 = dma.done.wait [#allocation10], 2048  }
  0x13   :  { %1143 = vsyncadd [#allocation10], 4294965248  ;;  %v914_v0 = vld [vmem:[#allocation6 + $0x38] sm:$0xff]  ;;  %v913_v1 = vld [vmem:[#allocation6 + $0x30] sm:$0xff]  ;;  %s724_s16 = sshll.u32 %s1239_s5, 4  ;;  %s725_s16 = int_to_ptr.hbm [resolvable:$true] %s724_s16 }
  0x14   :  { %212 = vmatpush.bf16.msra.mxu0 %v914_v0  ;;  %986 = vmatpush.bf16.msra.mxu3 %v914_v0  ;;  %v912_v2 = vld [vmem:[#allocation6 + $0x28] sm:$0xff]  ;;  %v911_v3 = vld [vmem:[#allocation6 + $0x20] sm:$0xff]  ;;  %v910_v4 = vld [vmem:[#allocation6 + $0x18] sm:$0xff] }
  0x15   :  { %v909_v5 = vld [vmem:[#allocation6 + $0x10] sm:$0xff]  ;;  %v908_v6 = vld [vmem:[#allocation6 + $0x8] sm:$0xff]  ;;  %v907_v7 = vld [vmem:[#allocation6] sm:$0xff] }
  0x16   :  { %v899_v8 = vld [vmem:[#allocation3] sm:$0xff]  ;;  %v905_v9 = vld [vmem:[#allocation3 + $0x30] sm:$0xff]  ;;  %v900_v10 = vld [vmem:[#allocation3 + $0x8] sm:$0xff] }
  0x17   :  { %v906_v11 = vld [vmem:[#allocation3 + $0x38] sm:$0xff]  ;;  %v901_v12 = vld [vmem:[#allocation3 + $0x10] sm:$0xff]  ;;  %v936_v18 = vld [vmem:[#allocation9 + $0x68] sm:$0xff] }
  0x18   :  { %213 = vmatpush.bf16.msra.mxu0 %v913_v1  ;;  %987 = vmatpush.bf16.msra.mxu3 %v913_v1  ;;  %v902_v13 = vld [vmem:[#allocation3 + $0x18] sm:$0xff]  ;;  %v937_v16 = vld [vmem:[#allocation9 + $0x70] sm:$0xff]  ;;  %v920_v19 = vld [vmem:[#allocation9 + $0x28] sm:$0xff] }
  0x19   :  { %v938_v14 = vld [vmem:[#allocation9 + $0x78] sm:$0xff]  ;;  %v921_v17 = vld [vmem:[#allocation9 + $0x30] sm:$0xff]  ;;  %v935_v20 = vld [vmem:[#allocation9 + $0x60] sm:$0xff] }
  0x1a   :  { %v922_v15 = vld [vmem:[#allocation9 + $0x38] sm:$0xff]  ;;  %504 = vmatpush.bf16.msra.mxu1 %v938_v14  ;;  %v919_v21 = vld [vmem:[#allocation9 + $0x20] sm:$0xff]  ;;  %v933_v25 = vld [vmem:[#allocation9 + $0x50] sm:$0xff] }
  0x1b   :  { %601 = vmatpush.bf16.msra.mxu2 %v922_v15  ;;  %v903_v22 = vld [vmem:[#allocation3 + $0x20] sm:$0xff]  ;;  %v934_v23 = vld [vmem:[#allocation9 + $0x58] sm:$0xff]  ;;  %v932_v26 = vld [vmem:[#allocation9 + $0x48] sm:$0xff] }
  0x1c   :  { %214 = vmatpush.bf16.msra.mxu0 %v912_v2  ;;  %988 = vmatpush.bf16.msra.mxu3 %v912_v2  ;;  %v918_v24 = vld [vmem:[#allocation9 + $0x18] sm:$0xff]  ;;  %v904_v27 = vld [vmem:[#allocation3 + $0x28] sm:$0xff]  ;;  %v931_v28 = vld [vmem:[#allocation9 + $0x40] sm:$0xff] }
  0x1d   :  { %v917_v29 = vld [vmem:[#allocation9 + $0x10] sm:$0xff]  ;;  %v916_v31 = vld [vmem:[#allocation9 + $0x8] sm:$0xff]  ;;  %v915_v32 = vld [vmem:[#allocation9] sm:$0xff] }
  0x1e   :  { %505 = vmatpush.bf16.msra.mxu1 %v937_v16  ;;  %v929_v30 = vld [vmem:[#allocation8 + $0x30] sm:$0xff]  ;;  %v923_v33 = vld [vmem:[#allocation8] sm:$0xff]  ;;  %v930_v34 = vld [vmem:[#allocation8 + $0x38] sm:$0xff] }
  0x1f   :  { %602 = vmatpush.bf16.msra.mxu2 %v921_v17  ;;  %v924_v35 = vld [vmem:[#allocation8 + $0x8] sm:$0xff]  ;;  %v925_v38 = vld [vmem:[#allocation8 + $0x10] sm:$0xff]  ;;  %v926_v45 = vld [vmem:[#allocation8 + $0x18] sm:$0xff] }
  0x20   :  { %215 = vmatpush.bf16.msra.mxu0 %v911_v3  ;;  %989 = vmatpush.bf16.msra.mxu3 %v911_v3  ;;  %v927_v51 = vld [vmem:[#allocation8 + $0x20] sm:$0xff]  ;;  %v928_v55 = vld [vmem:[#allocation8 + $0x28] sm:$0xff] }
  0x22   :  { %506 = vmatpush.bf16.msra.mxu1 %v936_v18 }
  0x23   :  { %603 = vmatpush.bf16.msra.mxu2 %v920_v19 }
  0x24   :  { %216 = vmatpush.bf16.msra.mxu0 %v910_v4  ;;  %990 = vmatpush.bf16.msra.mxu3 %v910_v4 }
  0x26   :  { %507 = vmatpush.bf16.msra.mxu1 %v935_v20 }
  0x27   :  { %604 = vmatpush.bf16.msra.mxu2 %v919_v21 }
  0x28   :  { %217 = vmatpush.bf16.msra.mxu0 %v909_v5  ;;  %991 = vmatpush.bf16.msra.mxu3 %v909_v5 }
  0x2a   :  { %508 = vmatpush.bf16.msra.mxu1 %v934_v23 }
  0x2b   :  { %605 = vmatpush.bf16.msra.mxu2 %v918_v24 }
  0x2c   :  { %218 = vmatpush.bf16.msra.mxu0 %v908_v6  ;;  %992 = vmatpush.bf16.msra.mxu3 %v908_v6 }
  0x2e   :  { %509 = vmatpush.bf16.msra.mxu1 %v933_v25 }
  0x2f   :  { %606 = vmatpush.bf16.msra.mxu2 %v917_v29 }
  0x30   :  { %219 = vmatpush.bf16.msra.mxu0 %v907_v7  ;;  %993 = vmatpush.bf16.msra.mxu3 %v907_v7 }
  0x32   :  { %510 = vmatpush.bf16.msra.mxu1 %v932_v26 }
  0x33   :  { %220 = vmatmul.bf16.vlgmr.msra.gmra.mxu0 %v899_v8  ;;  %250 = vmatmul.bf16.vlgmr.msra.gmra.mxu3 %v905_v9  ;;  %v1210_v9 = vld [vmem:[%s1238_s4] ss:$0 sm:$0xff]  ;;  %s1152_s4 = smov [#allocation11]  }
  0x34   :  { %994 = vmatpush.bf16.msrb.mxu3 %v938_v14  ;;  %607 = vmatpush.bf16.msra.mxu2 %v916_v31  ;;  %s722_s13 = sshll.u32 %s1152_s4, 4  ;;  %s723_s13 = int_to_ptr.vmem [resolvable:$true] %s722_s13 }
  0x36   :  { %511 = vmatpush.bf16.msra.mxu1 %v931_v28 }
  0x38   :  { %995 = vmatpush.bf16.msrb.mxu3 %v937_v16  ;;  %608 = vmatpush.bf16.msra.mxu2 %v915_v32 }
  0x39   :  { %512 = vmatmul.bf16.vlgmr.msra.gmra.mxu1 %v923_v33 }
  0x3c   :  { %996 = vmatpush.bf16.msrb.mxu3 %v936_v18 }
  0x40   :  { %997 = vmatpush.bf16.msrb.mxu3 %v935_v20 }
  0x43   :  { %225 = vmatmul.bf16.gmra.mxu0 %v900_v10  ;;  %255 = vmatmul.bf16.gmra.mxu3 %v906_v11 }
  0x44   :  { %998 = vmatpush.bf16.msrb.mxu3 %v934_v23 }
  0x48   :  { %999 = vmatpush.bf16.msrb.mxu3 %v933_v25 }
  0x49   :  { %517 = vmatmul.bf16.gmra.mxu1 %v924_v35 }
  0x4c   :  { %1000 = vmatpush.bf16.msrb.mxu3 %v932_v26 }
  0x50   :  { %1001 = vmatpush.bf16.msrb.mxu3 %v931_v28 }
  0x53   :  { %230 = vmatmul.bf16.gmra.mxu0 %v901_v12  ;;  %542 = vmatmul.bf16.vlgmr.msrb.gmra.mxu3 %v929_v30 }
  0x54   :  { %1002 = vmatpush.bf16.msra.mxu3 %v922_v15 }
  0x58   :  { %1003 = vmatpush.bf16.msra.mxu3 %v921_v17 }
  0x59   :  { %522 = vmatmul.bf16.gmra.mxu1 %v925_v38 }
  0x5c   :  { %1004 = vmatpush.bf16.msra.mxu3 %v920_v19 }
  0x60   :  { %1005 = vmatpush.bf16.msra.mxu3 %v919_v21 }
  0x63   :  { %235 = vmatmul.bf16.gmra.mxu0 %v902_v13  ;;  %547 = vmatmul.bf16.gmra.mxu3 %v930_v34 }
  0x64   :  { %1006 = vmatpush.bf16.msra.mxu3 %v918_v24 }
  0x68   :  { %1007 = vmatpush.bf16.msra.mxu3 %v917_v29 }
  0x69   :  { %527 = vmatmul.bf16.gmra.mxu1 %v926_v45 }
  0x6c   :  { %1008 = vmatpush.bf16.msra.mxu3 %v916_v31 }
  0x70   :  { %1009 = vmatpush.bf16.msra.mxu3 %v915_v32 }
  0x73   :  { %240 = vmatmul.bf16.gmra.mxu0 %v903_v22 }
  0x79   :  { %532 = vmatmul.bf16.gmra.mxu1 %v927_v51 }
  0x83   :  { %245 = vmatmul.bf16.gmra.mxu0 %v904_v27 }
  0x89   :  { %537 = vmatmul.bf16.gmra.mxu1 %v928_v55 }
  0xb0   :  { %v221_v36 = vpop.f32.mrf.mxu0 }
  0xb6   :  { %v251_v37 = vpop.f32.mrf.mxu3  ;;  %v513_v2 = vpop.f32.mrf.mxu1 }
  0xb8   :  { %v223_v39 = vpop.f32.mrf.mxu0 }
  0xb9   :  { %v352_v40 = vpack.c.bf16 %v223_v39, %v221_v36 }
  0xbb   :  { %609 = vmatmul.bf16.vlgmr.msra.gmra.mxu2 %v352_v40 }
  0xbe   :  { %v253_v41 = vpop.f32.mrf.mxu3  ;;  %v515_v4 = vpop.f32.mrf.mxu1 }
  0xbf   :  { %v358_v42 = vpack.c.bf16 %v253_v41, %v251_v37 }
  0xc0   :  { %v226_v43 = vpop.f32.mrf.mxu0 }
  0xc1   :  { %639 = vmatmul.bf16.vlgmr.msra.gmra.mxu3 %v358_v42 }
  0xc6   :  { %v256_v44 = vpop.f32.mrf.mxu3  ;;  %v518_v6 = vpop.f32.mrf.mxu1 }
  0xc8   :  { %v228_v46 = vpop.f32.mrf.mxu0 }
  0xc9   :  { %v353_v47 = vpack.c.bf16 %v228_v46, %v226_v43 }
  0xcb   :  { %614 = vmatmul.bf16.gmra.mxu2 %v353_v47 }
  0xce   :  { %v258_v48 = vpop.f32.mrf.mxu3  ;;  %v520_v12 = vpop.f32.mrf.mxu1 }
  0xcf   :  { %v359_v49 = vpack.c.bf16 %v258_v48, %v256_v44 }
  0xd0   :  { %v231_v50 = vpop.f32.mrf.mxu0 }
  0xd1   :  { %644 = vmatmul.bf16.gmra.mxu3 %v359_v49 }
  0xd6   :  { %v543_v0 = vpop.f32.mrf.mxu3  ;;  %v523_v26 = vpop.f32.mrf.mxu1 }
  0xd8   :  { %v233_v52 = vpop.f32.mrf.mxu0 }
  0xd9   :  { %v354_v53 = vpack.c.bf16 %v233_v52, %v231_v50 }
  0xdb   :  { %619 = vmatmul.bf16.gmra.mxu2 %v354_v53 }
  0xde   :  { %v545_v1 = vpop.f32.mrf.mxu3  ;;  %v525_v36 = vpop.f32.mrf.mxu1 }
  0xe0   :  { %v236_v54 = vpop.f32.mrf.mxu0 }
  0xe6   :  { %v548_v3 = vpop.f32.mrf.mxu3  ;;  %v528_v49 = vpop.f32.mrf.mxu1 }
  0xe8   :  { %v238_v56 = vpop.f32.mrf.mxu0 }
  0xe9   :  { %v355_v57 = vpack.c.bf16 %v238_v56, %v236_v54 }
  0xeb   :  { %624 = vmatmul.bf16.gmra.mxu2 %v355_v57 }
  0xee   :  { %v550_v5 = vpop.f32.mrf.mxu3  ;;  %v530_v57 = vpop.f32.mrf.mxu1 }
  0xf0   :  { %v241_v58 = vpop.f32.mrf.mxu0 }
  0xf8   :  { %v243_v59 = vpop.f32.mrf.mxu0 }
  0xf9   :  { %v356_v60 = vpack.c.bf16 %v243_v59, %v241_v58 }
  0xfb   :  { %629 = vmatmul.bf16.gmra.mxu2 %v356_v60 }
 0x100   :  { %v246_v61 = vpop.f32.mrf.mxu0 }
 0x108   :  { %v248_v62 = vpop.f32.mrf.mxu0 }
 0x109   :  { %v357_v63 = vpack.c.bf16 %v248_v62, %v246_v61 }
 0x10b   :  { %634 = vmatmul.bf16.gmra.mxu2 %v357_v63  ;;  %v533_v63 = vpop.f32.mrf.mxu1 }
 0x13e   :  { %v610_v7 = vpop.f32.mrf.mxu2 }
 0x13f   :  { %v611_v8 = vadd.f32 %v610_v7, %v513_v2 }
 0x141   :  { %v654_v13 = vadd.f32 %v1210_v9, %v611_v8 }
 0x143   :  { %v670_v17 = vmax.f32 %v654_v13, 0.0 }
 0x144   :  { %v640_v10 = vpop.f32.mrf.mxu3 }
 0x145   :  { %v641_v15 = vadd.f32 %v640_v10, %v543_v0 }
 0x146   :  { %v612_v11 = vpop.f32.mrf.mxu2 }
 0x147   :  { %v613_v14 = vadd.f32 %v612_v11, %v515_v4  ;;  %v666_v19 = vadd.f32 %v1210_v9, %v641_v15 }
 0x149   :  { %v655_v16 = vadd.f32 %v1210_v9, %v613_v14  ;;  %v682_v24 = vmax.f32 %v666_v19, 0.0 }
 0x14b   :  { %v671_v18 = vmax.f32 %v655_v16, 0.0 }
 0x14c   :  { %v642_v20 = vpop.f32.mrf.mxu3 }
 0x14d   :  { %v942_v21 = vpack.c.bf16 %v671_v18, %v670_v17  ;;  %v643_v22 = vadd.f32 %v642_v20, %v545_v1 }
 0x14e   :  { %v615_v23 = vpop.f32.mrf.mxu2 }
 0x14f   :  { %943 = vst [vmem:[#allocation11] sm:$0xff] %v942_v21   ;;  %v667_v25 = vadd.f32 %v1210_v9, %v643_v22  ;;  %v616_v28 = vadd.f32 %v615_v23, %v518_v6 }
 0x151   :  { %v683_v27 = vmax.f32 %v667_v25, 0.0  ;;  %v656_v32 = vadd.f32 %v1210_v9, %v616_v28 }
 0x153   :  { %v972_v29 = vpack.c.bf16 %v683_v27, %v682_v24  ;;  %v672_v37 = vmax.f32 %v656_v32, 0.0 }
 0x154   :  { %v645_v30 = vpop.f32.mrf.mxu3 }
 0x155   :  { %984 = vst [vmem:[#allocation11 + $0x30] sm:$0xff] %v972_v29   ;;  %v646_v34 = vadd.f32 %v645_v30, %v548_v3 }
 0x156   :  { %v617_v31 = vpop.f32.mrf.mxu2 }
 0x157   :  { %v618_v33 = vadd.f32 %v617_v31, %v520_v12  ;;  %v668_v39 = vadd.f32 %v1210_v9, %v646_v34 }
 0x159   :  { %v657_v35 = vadd.f32 %v1210_v9, %v618_v33  ;;  %v684_v44 = vmax.f32 %v668_v39, 0.0 }
 0x15b   :  { %v673_v38 = vmax.f32 %v657_v35, 0.0 }
 0x15c   :  { %v647_v40 = vpop.f32.mrf.mxu3 }
 0x15d   :  { %v947_v41 = vpack.c.bf16 %v673_v38, %v672_v37  ;;  %v648_v42 = vadd.f32 %v647_v40, %v550_v5  ;;  %v535_v5 = vpop.f32.mrf.mxu1 }
 0x15e   :  { %v620_v43 = vpop.f32.mrf.mxu2 }
 0x15f   :  { %979 = vst [vmem:[#allocation11 + $0x8] sm:$0xff] %v947_v41   ;;  %v669_v45 = vadd.f32 %v1210_v9, %v648_v42  ;;  %v621_v47 = vadd.f32 %v620_v43, %v523_v26 }
 0x161   :  { %v685_v46 = vmax.f32 %v669_v45, 0.0  ;;  %v658_v51 = vadd.f32 %v1210_v9, %v621_v47 }
 0x163   :  { %v977_v48 = vpack.c.bf16 %v685_v46, %v684_v44  ;;  %v674_v54 = vmax.f32 %v658_v51, 0.0 }
 0x165   :  { %985 = vst [vmem:[#allocation11 + $0x38] sm:$0xff] %v977_v48   ;;  %v538_v14 = vpop.f32.mrf.mxu1 }
 0x166   :  { %v622_v50 = vpop.f32.mrf.mxu2 }
 0x167   :  { %v623_v52 = vadd.f32 %v622_v50, %v525_v36 }
 0x169   :  { %v659_v53 = vadd.f32 %v1210_v9, %v623_v52 }
 0x16b   :  { %v675_v55 = vmax.f32 %v659_v53, 0.0 }
 0x16d   :  { %v952_v56 = vpack.c.bf16 %v675_v55, %v674_v54  ;;  %v540_v18 = vpop.f32.mrf.mxu1 }
 0x16e   :  { %v625_v58 = vpop.f32.mrf.mxu2 }
 0x16f   :  { %980 = vst [vmem:[#allocation11 + $0x10] sm:$0xff] %v952_v56   ;;  %v626_v59 = vadd.f32 %v625_v58, %v528_v49 }
 0x171   :  { %v660_v61 = vadd.f32 %v1210_v9, %v626_v59 }
 0x173   :  { %v676_v1 = vmax.f32 %v660_v61, 0.0 }
 0x176   :  { %v627_v60 = vpop.f32.mrf.mxu2 }
 0x177   :  { %v628_v62 = vadd.f32 %v627_v60, %v530_v57 }
 0x179   :  { %v661_v0 = vadd.f32 %v1210_v9, %v628_v62 }
 0x17b   :  { %v677_v2 = vmax.f32 %v661_v0, 0.0 }
 0x17d   :  { %v957_v3 = vpack.c.bf16 %v677_v2, %v676_v1 }
 0x17e   :  { %v630_v4 = vpop.f32.mrf.mxu2 }
 0x17f   :  { %981 = vst [vmem:[#allocation11 + $0x18] sm:$0xff] %v957_v3   ;;  %v631_v6 = vadd.f32 %v630_v4, %v533_v63 }
 0x181   :  { %v662_v8 = vadd.f32 %v1210_v9, %v631_v6 }
 0x183   :  { %v678_v12 = vmax.f32 %v662_v8, 0.0 }
 0x186   :  { %v632_v7 = vpop.f32.mrf.mxu2 }
 0x187   :  { %v633_v10 = vadd.f32 %v632_v7, %v535_v5 }
 0x189   :  { %v663_v11 = vadd.f32 %v1210_v9, %v633_v10 }
 0x18b   :  { %v679_v13 = vmax.f32 %v663_v11, 0.0 }
 0x18d   :  { %v962_v15 = vpack.c.bf16 %v679_v13, %v678_v12 }
 0x18e   :  { %v635_v16 = vpop.f32.mrf.mxu2 }
 0x18f   :  { %982 = vst [vmem:[#allocation11 + $0x20] sm:$0xff] %v962_v15   ;;  %v636_v17 = vadd.f32 %v635_v16, %v538_v14 }
 0x191   :  { %v664_v20 = vadd.f32 %v1210_v9, %v636_v17 }
 0x193   :  { %v680_v23 = vmax.f32 %v664_v20, 0.0 }
 0x196   :  { %v637_v19 = vpop.f32.mrf.mxu2 }
 0x197   :  { %v638_v21 = vadd.f32 %v637_v19, %v540_v18 }
 0x199   :  { %v665_v22 = vadd.f32 %v1210_v9, %v638_v21 }
 0x19b   :  { %v681_v24 = vmax.f32 %v665_v22, 0.0 }
 0x19d   :  { %v967_v25 = vpack.c.bf16 %v681_v24, %v680_v23 }
 0x19f   :  { %983 = vst [vmem:[#allocation11 + $0x28] sm:$0xff] %v967_v25  }
 0x1a0   :  { %730 = dma.vmem_to_hbm [thread:$0]  %s723_s13, 1024, %s725_s16, [#allocation5], %s1147_s26, %s1147_s26, %s1148_s27  }
 0x1a1   :  { %1144 = dma.done.wait [#allocation5], 1024  }
 0x1a2   :  { %1145 = vsyncadd [#allocation5], 4294966272 }
 0x1a3   :  { %735 = vsyncpa [#allocation4], 1 }
 0x1a4   :  { %736 = vsyncpa [#allocation7], 1 }
 0x1a5   :  { %737 = vsyncpa [#allocation10], 1 }
 0x1a6   :  { %738 = vsyncpa [#allocation5], 1 }

</bundles_post_ra>
